<compile_context>
chip_gen: v7x
topology: tpu7x:2x2x1
jax: 0.10.0
libtpu: 0.0.40
codegen_flags: <defaults>
</compile_context>

<pallas_src>
from math import floor

import jax
import jax.numpy as jnp
from jax.experimental import pallas as pl
from jax.experimental.pallas import tpu as pltpu


def _round_up(n: int, m: int) -> int:
    return ((n + m - 1) // m) * m


# ----------------------------------------------------------------------------
# Kernel body: one batch tile of   softplus( relu(x@W1+b1) @ W2 + b2 )
# ----------------------------------------------------------------------------
def _mlp_kernel(x_ref, w1_ref, b1_ref, w2_ref, b2_ref, o_ref):
    # Cast f32 x -> bf16 on the VPU (hidden under MXU work); f32 accumulation.
    x = x_ref[...].astype(w1_ref.dtype)
    h = jnp.dot(x, w1_ref[...], preferred_element_type=jnp.float32)
    h = jnp.maximum(h + b1_ref[...], 0.0)          # (TB, Hp) + (1, Hp), ReLU

    # Dropout (eval mode) == identity.

    y = jnp.dot(h.astype(w2_ref.dtype), w2_ref[...],
                preferred_element_type=jnp.float32)
    y = y + b2_ref[...]                            # (TB, O) + (1, O)

    # Numerically stable softplus: max(y,0) + log1p(exp(-|y|))
    y = jnp.maximum(y, 0.0) + jnp.log1p(jnp.exp(-jnp.abs(y)))
    o_ref[...] = y.astype(o_ref.dtype)


# ----------------------------------------------------------------------------
# One-time parameter preparation (pad hidden dim, cast weights to bf16).
# Call once per sub-network and reuse across batches.
# ----------------------------------------------------------------------------
def prepare_params(w1, b1, w2, b2, *, use_bf16: bool = True):
    """w1: (in, hid), b1: (hid,) or (1,hid), w2: (hid, out), b2: (out,) or (1,out)."""
    b1 = jnp.asarray(b1).reshape(1, -1)
    b2 = jnp.asarray(b2).reshape(1, -1)
    in_dim, hid = w1.shape
    assert w2.shape[0] == hid and b1.shape[1] == hid and b2.shape[1] == w2.shape[1]

    hid_p = _round_up(hid, 128)                    # lane-dense hidden dim
    mm_dtype = jnp.bfloat16 if use_bf16 else jnp.float32

    # Padded hidden lanes are inert: b1_pad = 0 -> ReLU(0) = 0, and the
    # corresponding W2 rows are 0, so they contribute nothing to the output.
    w1p = jnp.pad(w1, ((0, 0), (0, hid_p - hid))).astype(mm_dtype)
    b1p = jnp.pad(b1, ((0, 0), (0, hid_p - hid))).astype(jnp.float32)
    w2p = jnp.pad(w2, ((0, hid_p - hid), (0, 0))).astype(mm_dtype)
    b2p = b2.astype(jnp.float32)
    return w1p, b1p, w2p, b2p


# ----------------------------------------------------------------------------
# Tile / VMEM sizing (per TPU generation).
# ----------------------------------------------------------------------------
def _vmem_capacity_bytes(default: int = 64 * 1024 * 1024) -> int:
    try:
        return int(pltpu.get_tpu_info().vmem_capacity_bytes)
    except Exception:
        return default          # conservative (v7x-like) fallback


def _pick_tile_and_vmem(B, in_dim, hid_p, out_dim, batch_tile):
    vmem_cap = _vmem_capacity_bytes()
    if batch_tile is None:
        # v5e / v6e (128 MiB VMEM) -> big tiles; v7x (64 MiB) -> moderate.
        batch_tile = 2048 if vmem_cap >= 96 * 1024 * 1024 else 1024

    # Grid-invariant residents: bf16 weights + f32 biases.
    resident = 2 * (in_dim * hid_p + hid_p * out_dim) + 4 * (hid_p + out_dim)

    def footprint(tb):
        return (resident
                + 2 * tb * in_dim * 4      # double-buffered f32 x tile
                + 2 * tb * out_dim * 4     # double-buffered f32 out tile
                + tb * hid_p * 4)          # hidden intermediate

    if B <= 16:
        tb = _round_up(B, 8)
    else:
        tb = min(batch_tile, _round_up(B, 16))     # multiple of 16 (bf16 sublanes)
        if B > 512:
            # >= 2 grid steps so the "parallel" axis shards across both v7x TCs.
            tb = min(tb, _round_up(pl.cdiv(B, 2), 256))

    # Shrink until the footprint fits comfortably in VMEM.
    budget = int(0.55 * vmem_cap)
    while tb > 16 and footprint(tb) > budget:
        tb = max(16, _round_up(tb // 2, 16))

    vmem_limit = min(int(0.75 * vmem_cap),
                     max(32 * 1024 * 1024, footprint(tb) + 16 * 1024 * 1024))
    vmem_limit = max(vmem_limit, footprint(tb) + 4 * 1024 * 1024)
    return tb, int(vmem_limit)


# ----------------------------------------------------------------------------
# Forward wrappers.
# ----------------------------------------------------------------------------
def forward_prepared(x, w1p, b1p, w2p, b2p, *, batch_tile=None):
    """x: (B, in_dim) f32; prepared params from prepare_params()."""
    B, in_dim = x.shape
    hid_p = w1p.shape[1]
    out_dim = w2p.shape[1]

    tb, vmem_limit = _pick_tile_and_vmem(B, in_dim, hid_p, out_dim, batch_tile)
    grid = (pl.cdiv(B, tb),)                       # remainder tile masked by Pallas

    return pl.pallas_call(
        _mlp_kernel,
        out_shape=jax.ShapeDtypeStruct((B, out_dim), jnp.float32),
        grid=grid,
        in_specs=[
            pl.BlockSpec((tb, in_dim), lambda i: (i, 0)),      # x: batch-tiled, f32
            pl.BlockSpec((in_dim, hid_p), lambda i: (0, 0)),   # W1: VMEM-resident
            pl.BlockSpec((1, hid_p), lambda i: (0, 0)),        # b1: resident
            pl.BlockSpec((hid_p, out_dim), lambda i: (0, 0)),  # W2: resident
            pl.BlockSpec((1, out_dim), lambda i: (0, 0)),      # b2: resident
        ],
        out_specs=pl.BlockSpec((tb, out_dim), lambda i: (i, 0)),
        compiler_params=pltpu.CompilerParams(
            dimension_semantics=("parallel",),                 # megacore on v7x
            vmem_limit_bytes=vmem_limit,
        ),
    )(x.astype(jnp.float32), w1p, b1p, w2p, b2p)


def neural_network_model_forward(x, w1, b1, w2, b2, *,
                                 batch_tile=None, use_bf16: bool = True):
    """Full forward: pads/casts weights then runs the Pallas kernel.

    x:  (B, inputdim) f32
    w1: (inputdim, hidden)   (PyTorch layer1.weight.T)
    b1: (hidden,) or (1, hidden)
    w2: (hidden, sub_outputdim)  (PyTorch layer3.weight.T)
    b2: (sub_outputdim,) or (1, sub_outputdim)
    returns (B, sub_outputdim) f32
    """
    params = prepare_params(w1, b1, w2, b2, use_bf16=use_bf16)
    return forward_prepared(x, *params, batch_tile=batch_tile)


def reference_forward(x, w1, b1, w2, b2, *, use_bf16: bool = True):
    b1 = jnp.asarray(b1).reshape(1, -1)
    b2 = jnp.asarray(b2).reshape(1, -1)
    mm_dtype = jnp.bfloat16 if use_bf16 else jnp.float32
    xc, w1c, w2c = x.astype(mm_dtype), w1.astype(mm_dtype), w2.astype(mm_dtype)
    h = jnp.dot(xc, w1c, preferred_element_type=jnp.float32) + b1
    h = jnp.maximum(h, 0.0).astype(mm_dtype)
    y = jnp.dot(h, w2c, preferred_element_type=jnp.float32) + b2
    return jnp.maximum(y, 0.0) + jnp.log1p(jnp.exp(-jnp.abs(y)))


if __name__ == "__main__":
    # Shapes consistent with the module: inputdim, sub_outputdim,
    # hidden_dim = floor(sub_outputdim / 2)
    batch = 8
    inputdim = 32
    sub_outputdim = 64
    hidden_dim = floor(sub_outputdim / 2)  # 32

    key = jax.random.PRNGKey(0)
    kx, k1, k2, k3, k4 = jax.random.split(key, 5)

    x = jax.random.normal(kx, (batch, inputdim), dtype=jnp.float32)
    # Deterministic init, stored as (in, out) == PyTorch weight.T
    w1 = jax.random.normal(k1, (inputdim, hidden_dim), dtype=jnp.float32) * 0.1
    b1 = jax.random.normal(k2, (hidden_dim,), dtype=jnp.float32) * 0.01
    w2 = jax.random.normal(k3, (hidden_dim, sub_outputdim), dtype=jnp.float32) * 0.1
    b2 = jax.random.normal(k4, (sub_outputdim,), dtype=jnp.float32) * 0.01

    out = neural_network_model_forward(x, w1, b1, w2, b2)
    out = jax.block_until_ready(out)

    ref_bf16 = reference_forward(x, w1, b1, w2, b2, use_bf16=True)
    ref_f32 = reference_forward(x, w1, b1, w2, b2, use_bf16=False)

    assert out.shape == (batch, sub_outputdim)
    # Same bf16-operand / f32-accumulate math as the kernel -> tight tolerance.
    assert jnp.allclose(out, ref_bf16, atol=1e-4, rtol=1e-4)
    # Sanity against full-f32 math -> looser (bf16 quantization of operands).
    assert jnp.allclose(out, ref_f32, atol=5e-2, rtol=5e-2)

    print("KERNEL_OK")
</pallas_src>

<mosaic_0001>
module attributes {stable_mosaic.version = 11 : i64} {
  func.func @_mlp_kernel(%arg0: i32, %arg1: memref<8x32xf32, #tpu.memory_space<vmem>>, %arg2: memref<32x128xbf16, #tpu.memory_space<vmem>>, %arg3: memref<1x128xf32, #tpu.memory_space<vmem>>, %arg4: memref<128x64xbf16, #tpu.memory_space<vmem>>, %arg5: memref<1x64xf32, #tpu.memory_space<vmem>>, %arg6: memref<8x64xf32, #tpu.memory_space<vmem>>) attributes {dimension_semantics = [#tpu.dimension_semantics<parallel>], iteration_bounds = array<i64: 1>, scalar_prefetch = 0 : i64, scratch_operands = 0 : i64, tpu.core_type = #tpu.core_type<tc>, window_params = [{transform_indices = @transform_0, window_bounds = array<i64: 8, 32>}, {pipeline_mode = #tpu.pipeline_mode<synchronous>, transform_indices = @transform_1, window_bounds = array<i64: 32, 128>}, {pipeline_mode = #tpu.pipeline_mode<synchronous>, transform_indices = @transform_2, window_bounds = array<i64: 1, 128>}, {pipeline_mode = #tpu.pipeline_mode<synchronous>, transform_indices = @transform_3, window_bounds = array<i64: 128, 64>}, {pipeline_mode = #tpu.pipeline_mode<synchronous>, transform_indices = @transform_4, window_bounds = array<i64: 1, 64>}, {transform_indices = @transform_5, window_bounds = array<i64: 8, 64>}]} {
    %c0 = arith.constant 0 : index
    %c0_0 = arith.constant 0 : index
    %0 = vector.load %arg1[%c0, %c0_0] : memref<8x32xf32, #tpu.memory_space<vmem>>, vector<8x32xf32>
    %1 = arith.truncf %0 : vector<8x32xf32> to vector<8x32xbf16>
    %c0_1 = arith.constant 0 : index
    %c0_2 = arith.constant 0 : index
    %2 = vector.load %arg2[%c0_1, %c0_2] : memref<32x128xbf16, #tpu.memory_space<vmem>>, vector<32x128xbf16>
    %cst = arith.constant dense<0.000000e+00> : vector<8x128xf32>
    %3 = tpu.matmul %1, %2, %cst {dimension_numbers = #tpu.dot_dimension_numbers<[1], [0], [0], [1], [0, 0, 1, 1], [], []>} : vector<8x32xbf16>, vector<32x128xbf16>, vector<8x128xf32> -> vector<8x128xf32>
    %c0_3 = arith.constant 0 : index
    %c0_4 = arith.constant 0 : index
    %4 = vector.load %arg3[%c0_3, %c0_4] : memref<1x128xf32, #tpu.memory_space<vmem>>, vector<1x128xf32>
    %5 = vector.broadcast %4 : vector<1x128xf32> to vector<8x128xf32>
    %6 = arith.addf %3, %5 : vector<8x128xf32>
    %cst_5 = arith.constant 0.000000e+00 : f32
    %7 = vector.broadcast %cst_5 : f32 to vector<8x128xf32>
    %8 = arith.maximumf %6, %7 : vector<8x128xf32>
    %9 = arith.truncf %8 : vector<8x128xf32> to vector<8x128xbf16>
    %c0_6 = arith.constant 0 : index
    %c0_7 = arith.constant 0 : index
    %10 = vector.load %arg4[%c0_6, %c0_7] : memref<128x64xbf16, #tpu.memory_space<vmem>>, vector<128x64xbf16>
    %cst_8 = arith.constant dense<0.000000e+00> : vector<8x64xf32>
    %11 = tpu.matmul %9, %10, %cst_8 {dimension_numbers = #tpu.dot_dimension_numbers<[1], [0], [0], [1], [0, 0, 1, 1], [], []>} : vector<8x128xbf16>, vector<128x64xbf16>, vector<8x64xf32> -> vector<8x64xf32>
    %c0_9 = arith.constant 0 : index
    %c0_10 = arith.constant 0 : index
    %12 = vector.load %arg5[%c0_9, %c0_10] : memref<1x64xf32, #tpu.memory_space<vmem>>, vector<1x64xf32>
    %13 = vector.broadcast %12 : vector<1x64xf32> to vector<8x64xf32>
    %14 = arith.addf %11, %13 : vector<8x64xf32>
    %cst_11 = arith.constant 0.000000e+00 : f32
    %15 = vector.broadcast %cst_11 : f32 to vector<8x64xf32>
    %16 = arith.maximumf %14, %15 : vector<8x64xf32>
    %17 = math.absf %14 : vector<8x64xf32>
    %cst_12 = arith.constant 0.000000e+00 : f32
    %18 = vector.broadcast %cst_12 : f32 to vector<8x64xf32>
    %19 = arith.subf %18, %17 : vector<8x64xf32>
    %20 = math.exp %19 : vector<8x64xf32>
    %21 = math.log1p %20 : vector<8x64xf32>
    %22 = arith.addf %16, %21 : vector<8x64xf32>
    %c0_13 = arith.constant 0 : index
    %c0_14 = arith.constant 0 : index
    %23 = vector.load %arg6[%c0_13, %c0_14] : memref<8x64xf32, #tpu.memory_space<vmem>>, vector<8x64xf32>
    tpu.vector_store %arg6[%c0_13, %c0_14], %22 {strides = array<i32>} : memref<8x64xf32, #tpu.memory_space<vmem>>, vector<8x64xf32>,
    return
  }
  func.func @transform_0(%arg0: i32) -> (i32, i32) {
    %c0_i32 = arith.constant 0 : i32
    %c0_i32_0 = arith.constant 0 : i32
    return %arg0, %c0_i32 : i32, i32
  }
  func.func @transform_1(%arg0: i32) -> (i32, i32) {
    %c0_i32 = arith.constant 0 : i32
    %c0_i32_0 = arith.constant 0 : i32
    %c0_i32_1 = arith.constant 0 : i32
    return %c0_i32, %c0_i32_0 : i32, i32
  }
  func.func @transform_2(%arg0: i32) -> (i32, i32) {
    %c0_i32 = arith.constant 0 : i32
    %c0_i32_0 = arith.constant 0 : i32
    %c0_i32_1 = arith.constant 0 : i32
    return %c0_i32, %c0_i32_0 : i32, i32
  }
  func.func @transform_3(%arg0: i32) -> (i32, i32) {
    %c0_i32 = arith.constant 0 : i32
    %c0_i32_0 = arith.constant 0 : i32
    %c0_i32_1 = arith.constant 0 : i32
    return %c0_i32, %c0_i32_0 : i32, i32
  }
  func.func @transform_4(%arg0: i32) -> (i32, i32) {
    %c0_i32 = arith.constant 0 : i32
    %c0_i32_0 = arith.constant 0 : i32
    %c0_i32_1 = arith.constant 0 : i32
    return %c0_i32, %c0_i32_0 : i32, i32
  }
  func.func @transform_5(%arg0: i32) -> (i32, i32) {
    %c0_i32 = arith.constant 0 : i32
    %c0_i32_0 = arith.constant 0 : i32
    return %arg0, %c0_i32 : i32, i32
  }
}

</mosaic_0001>

<bundles_post_ra>
// kernel: tpu_custom_call.1
= control target key start
LH: loop header
LB: loop body
LE: loop exit
PB: predicated region body
PF: predicated region fallthrough
CT: control target
= control target key end

     0   :  { %v329_v1 = vmov 0.0   ;;  %vm330_vm0 = vmmov 0   ;;  %vm47_vm1 = vcmask 261120   ;;  %s413_s0 = inlined_call_operand.vmem [shape: f32[8,32], index: 0, kind: input, shape index: {}]   ;;  %s414_s1 = inlined_call_operand.vmem [shape: bf16[32,128], index: 1, kind: input, shape index: {}]   ;;  %s415_s2 = inlined_call_operand.vmem [shape: f32[1,128], index: 2, kind: input, shape index: {}]   ;;  %s416_s3 = inlined_call_operand.vmem [shape: bf16[128,64], index: 3, kind: input, shape index: {}]   ;;  %s417_s4 = inlined_call_operand.vmem [shape: f32[1,64], index: 4, kind: input, shape index: {}]   ;;  %s418_s5 = inlined_call_operand.hbm [shape: f32[8,64], index: 5, kind: output, shape index: {}]  }
   0x1   :  { %v291_v0 = vld [vmem:[%s414_s1] sm:$0xff]   ;;  %260 = vmatprep.subr.bf16.mxu0 %v329_v1  ;;  %v292_v2 = vld [vmem:[%s414_s1 + $0x8] sm:$0xff]   ;;  %268 = vmatprep.subr.bf16.mxu1 %v329_v1  ;;  %v295_v7 = vld [vmem:[%s416_s3 + $0x10] sm:$0xff]  }
   0x2   :  { %261 = vmatpush3.bf16.msra.mxu0 %v291_v0  ;;  %264 = vmatprep.mubr.msk.bf16.mxu0 %vm330_vm0, %v329_v1  ;;  %v22_v3 = vld [vmem:[%s413_s0] sm:$0xff]  ;;  %v294_v6 = vld [vmem:[%s416_s3 + $0x8] sm:$0xff]  }
   0x3   :  { %262 = vmatprep.subr.bf16.mxu0 %v329_v1  ;;  %v293_v4 = vld [vmem:[%s416_s3] sm:$0xff]   ;;  %284 = vmatprep.mubr.msk.bf16.mxu1 %vm330_vm0, %v329_v1  ;;  %v23_v5 = vpack.c.bf16 %v22_v3, %v22_v3 }
   0x4   :  { %269 = vmatpush3.bf16.msra.mxu1 %v293_v4 }
   0x5   :  { %270 = vmatprep.subr.bf16.mxu1 %v329_v1 }
   0x6   :  { %263 = vmatpush3.bf16.msra.mxu0 %v292_v2 }
   0x8   :  { %271 = vmatpush3.bf16.msra.mxu1 %v294_v6 }
   0x9   :  { %265 = vmatmul.mubr.msk.bf16.vlgmr.msra.gmra.mrb[0].mxu0 %vm47_vm1, %v23_v5  ;;  %272 = vmatprep.subr.bf16.mxu1 %v329_v1 }
   0xa   :  { %10 = vsyncpa [#allocation3], 0  ;;  %v296_v8 = vld [vmem:[%s416_s3 + $0x18] sm:$0xff]   ;;  %v297_v9 = vld [vmem:[%s416_s3 + $0x20] sm:$0xff]   ;;  %vm219_vm3 = vcmask 523264  }
   0xb   :  { %v298_v10 = vld [vmem:[%s416_s3 + $0x28] sm:$0xff]   ;;  %v299_v11 = vld [vmem:[%s416_s3 + $0x30] sm:$0xff]   ;;  %v300_v12 = vld [vmem:[%s416_s3 + $0x38] sm:$0xff]  }
   0xc   :  { %273 = vmatpush3.bf16.msra.mxu1 %v295_v7  ;;  %v235_v13 = vld [vmem:[%s415_s2] ss:$0 sm:$0xff]  ;;  %s331_s2 = smov [#allocation2]  }
   0xd   :  { %274 = vmatprep.subr.bf16.mxu1 %v329_v1  ;;  %v239_v21 = vld [vmem:[%s417_s4] ss:$0 sm:$0xff]  ;;  %s227_s3 = sshll.u32 %s331_s2, 4  ;;  %s228_s3 = int_to_ptr.vmem [resolvable:$true] %s227_s3 }
   0xe   :  { %s305_s4 = scalar_lea.vmem %s228_s3, 128  ;;  %p310_p1 = scmp.lt.s32.totalorder %s228_s3, %s228_s3 }
   0xf   :  { %p306_p0 = scmp.ne.s32.totalorder %s228_s3, %s305_s4  ;;  %p311_p2 = scmp.lt.s32.totalorder %s305_s4, %s305_s4 }
  0x10   :  { %275 = vmatpush3.bf16.msra.mxu1 %v296_v8 }
  0x11   :  { %276 = vmatprep.subr.bf16.mxu1 %v329_v1  ;;  %p312_p3 = por %p311_p2, %p310_p1 }
  0x13   :  { %p313_p4 = pnand %p312_p3, %p306_p0 }
  0x14   :  { %277 = vmatpush3.bf16.msra.mxu1 %v297_v9 }
  0x15   :  { %278 = vmatprep.subr.bf16.mxu1 %v329_v1 }
  0x18   :  { %279 = vmatpush3.bf16.msra.mxu1 %v298_v10 }
  0x19   :  { %280 = vmatprep.subr.bf16.mxu1 %v329_v1 }
  0x1c   :  { %281 = vmatpush3.bf16.msra.mxu1 %v299_v11 }
  0x1d   :  { %282 = vmatprep.subr.bf16.mxu1 %v329_v1 }
  0x20   :  { %283 = vmatpush3.bf16.msra.mxu1 %v300_v12 }
  0xdc   :  { %v85_v14 = vpop.f32.mrb[0].mxu0 }
  0xdd   :  { %v86_v15 = vadd.f32 %v235_v13, %v85_v14  ;;  %v266_v16 = vpop.f32.mrb[1].mxu0 }
  0xde   :  { %v88_v17 = vpop.f32.mrb[2].mxu0 }
  0xdf   :  { %v91_v18 = vmax.f32 %v86_v15, 0.0  ;;  %v267_v19 = vpop.f32.mrb[3].mxu0 }
  0xe1   :  { %v92_v20 = vpack.c.bf16 %v91_v18, %v91_v18 }
  0xe3   :  { %285 = vmatmul.mubr.bf16.vlgmr.msra.gmra.mrb[0].mxu1 %v92_v20 }
 0x1b6   :  { %v198_v22 = vpop.f32.mrb[0].mxu1 }
 0x1b7   :  { %v199_v23 = vadd.f32 %v239_v21, %v198_v22  ;;  %v286_v24 = vpop.f32.mrb[1].mxu1 }
 0x1b8   :  { %v201_v25 = vpop.f32.mrb[2].mxu1 }
 0x1b9   :  { %v205_v26 = vand.u32 2147483647, %v199_v23  ;;  %v287_v27 = vpop.f32.mrb[3].mxu1  ;;  %v204_v38 = vmax.f32 %v199_v23, 0.0 }
 0x1bb   :  { %v206_v28 = vsub.f32 0.0, %v205_v26 }
 0x1bd   :  { %v207_v29 = vmul.f32 1.442695, %v206_v28 }
 0x1bf   :  { %301 = vpow2.f32 %v207_v29 }
 0x1c9   :  { %v302_v30 = vpop.eup %301 }
 0x1ca   :  { %v209_v31 = vadd.f32 1.0, %v302_v30  ;;  %v212_v32 = vmul.f32 -0.5, %v302_v30  ;;  %v215_v34 = vand.u32 2147483647, %v302_v30 }
 0x1cc   :  { %303 = vlog2.f32 %v209_v31  ;;  %v213_v33 = vadd.f32 1.0, %v212_v32  ;;  %vm216_vm2 = vcmp.lt.f32.partialorder %v215_v34, 0.0004427343 }
 0x1ce   :  { %v214_v37 = vmul.f32 %v302_v30, %v213_v33 }
 0x1d6   :  { %v304_v35 = vpop.eup %303 }
 0x1d7   :  { %v211_v36 = vmul.f32 0.6931472, %v304_v35 }
 0x1d9   :  { %v217_v39 = vsel %vm216_vm2, %v214_v37, %v211_v36 }
 0x1da   :  { %v218_v40 = vadd.f32 %v217_v39, %v204_v38 }
 0x1dc   :  { %220 = vst.msk [vmem:[#allocation2] sm:$0xff] %vm219_vm3, %v218_v40 }
 0x1dd   :  { %316 = shalt.err (!%p313_p4)
}
 0x1de   :  { %s317_s19 = scalar_lea.hbm %s418_s5, 128 }
 0x1df   :  { %p318_p5 = scmp.ne.s32.totalorder %s418_s5, %s317_s19  ;;  %p321_p6 = scmp.lt.u32.totalorder %s317_s19, %s418_s5 }
 0x1e1   :  { %p323_p7 = pnand %p321_p6, %p318_p5 }
 0x1e3   :  { %326 = shalt.err (!%p323_p7)
}
 0x1e4   :  { %230 = dma.vmem_to_hbm [thread:$0]  %s228_s3, 128, %s418_s5, [#allocation3]  }
 0x1e5   :  { %327 = dma.done.wait [#allocation3], 128  }
 0x1e6   :  { %328 = vsyncadd [#allocation3], 4294967168 }
 0x1e7   :  { %234 = vsyncpa [#allocation3], 1 }

</bundles_post_ra>
